<compile_context>
chip_gen: v5e
topology: v5e:2x2
jax: 0.10.0
libtpu: 0.0.40
codegen_flags: <defaults>
</compile_context>

<pallas_src>
import functools

import jax
import jax.numpy as jnp
from jax import lax
from jax.experimental import pallas as pl
from jax.experimental.pallas import tpu as pltpu


def _round_up(x, m):
    return ((x + m - 1) // m) * m


def _cdiv(a, b):
    return -(-a // b)


def _vmem_capacity_bytes():
    """Best-effort query of physical VMEM size; None if unavailable."""
    try:
        info = pltpu.get_tpu_info()
    except Exception:
        return None
    for attr in ("vmem_capacity_bytes", "vmem_bytes"):
        v = getattr(info, attr, None)
        if isinstance(v, int) and v > 0:
            return v
    return None


def _budgets():
    """Return (tile_byte_budget, vmem_limit_bytes), generation-aware."""
    vmem = _vmem_capacity_bytes()
    if vmem is None:
        vmem = 64 << 20            # assume the smallest (v7x-class) VMEM
    if vmem >= (100 << 20):        # v5e / v6e: 128 MiB physical VMEM
        return 8 << 20, 80 << 20
    return 4 << 20, 48 << 20       # v7x: 64 MiB physical VMEM


def _focal_loss_kernel(logits_ref, targets_ref, out_ref, *, gamma, n_rows, tile_rows):
    # logits_ref: (TN, C) float, targets_ref: (TN, 1) int32,
    # out_ref: (1, 128) f32 lane-dense per-tile partial sum.
    x = logits_ref[...].astype(jnp.float32)                            # (TN, C)
    t = targets_ref[...]                                               # (TN, 1)

    # Numerically-stable log-sum-exp along the class axis.
    m = jnp.max(x, axis=-1, keepdims=True)                             # (TN, 1)
    z = x - m                                                          # (TN, C)
    lse = jnp.log(jnp.sum(jnp.exp(z), axis=-1, keepdims=True))         # (TN, 1)

    # Fused gather of z[target] via a lane iota (no materialized log-softmax).
    # TODO(synk): out-of-range targets silently give zt=0; no in-kernel check.
    col = lax.broadcasted_iota(jnp.int32, x.shape, 1)                  # (TN, C)
    zt = jnp.sum(jnp.where(col == t, z, 0.0), axis=-1, keepdims=True)  # (TN, 1)

    ce = lse - zt                          # per-sample cross entropy
    pt = jnp.exp(-ce)                      # probability of the target class
    u = 1.0 - pt

    g = float(gamma)
    if g.is_integer() and 0 <= g <= 8:
        gi = int(g)
        if gi == 0:
            w = jnp.ones_like(u)
        else:
            w = u
            for _ in range(gi - 1):        # repeated multiply: pure VALU
                w = w * u
    else:
        w = jnp.power(jnp.maximum(u, 0.0), g)

    loss = w * ce                                                       # (TN, 1)

    # Mask tail rows of the last (partial) block.  Only emitted when N does not
    # divide evenly; the select also stops any NaN/Inf garbage from the
    # out-of-bounds region of the input block.
    if n_rows % tile_rows != 0:
        row = (pl.program_id(0) * tile_rows
               + lax.broadcasted_iota(jnp.int32, loss.shape, 0))
        loss = jnp.where(row < n_rows, loss, 0.0)

    part = jnp.sum(loss, axis=0, keepdims=True)                         # (1, 1)
    out_ref[...] = jnp.broadcast_to(part, out_ref.shape)                # (1, 128)


def focal_loss(logits, targets, alpha=1.0, gamma=2.0, tile_rows=None):
    """logits: (N, C) float (f32 or bf16), targets: (N,) int -> scalar f32 focal loss."""
    n, c = logits.shape
    targets2d = targets.astype(jnp.int32).reshape(n, 1)

    tile_budget, vmem_limit = _budgets()
    bytes_per_row = 4 * c  # f32 working set inside the kernel

    if tile_rows is not None:
        tn = max(8, (int(tile_rows) // 8) * 8)
    else:
        # Large tiles (a few MiB) amortize per-grid-step overhead; cap at 8192 rows.
        tn = max(8, min(8192, (tile_budget // bytes_per_row) // 8 * 8))
        # Prefer several grid tiles (v7x has 2 TensorCores; also deepens the DMA
        # pipeline), but never shrink a tile below ~1 MiB for that reason alone.
        min_tile_rows = max(8, min(tn, ((1 << 20) // max(bytes_per_row, 1)) // 8 * 8))
        rows_for_8_tiles = _round_up(_cdiv(n, 8), 8)
        tn = min(tn, max(min_tile_rows, rows_for_8_tiles))

    if tn >= n:
        tn = n  # single tile: block == full array (no (8,128) divisibility needed)

    grid = _cdiv(n, tn)

    kernel = functools.partial(
        _focal_loss_kernel, gamma=float(gamma), n_rows=n, tile_rows=tn
    )

    partials = pl.pallas_call(
        kernel,
        out_shape=jax.ShapeDtypeStruct((1, grid * 128), jnp.float32),
        grid=(grid,),
        in_specs=[
            pl.BlockSpec((tn, c), lambda i: (i, 0)),        # logits row tile
            pl.BlockSpec((tn, 1), lambda i: (i, 0)),        # target column tile
        ],
        # Lane-dense (1, 128) partial-sum block per tile.
        out_specs=pl.BlockSpec((1, 128), lambda i: (0, i)),
        compiler_params=pltpu.CompilerParams(
            dimension_semantics=("parallel",),
            vmem_limit_bytes=vmem_limit,
        ),
    )(logits, targets2d)

    per_tile = partials.reshape(grid, 128)[:, 0]
    return jnp.float32(alpha) * jnp.sum(per_tile) / jnp.float32(n)


def _focal_loss_ref(logits, targets, alpha=1.0, gamma=2.0):
    logp = jax.nn.log_softmax(logits.astype(jnp.float32), axis=-1)
    ce = -jnp.take_along_axis(logp, targets[:, None].astype(jnp.int32), axis=-1)[:, 0]
    pt = jnp.exp(-ce)
    return jnp.mean(alpha * (1.0 - pt) ** gamma * ce)


if __name__ == "__main__":
    key = jax.random.PRNGKey(0)
    k1, k2, k3, k4, k5, k6 = jax.random.split(key, 6)

    # Case 1: tiny single-tile (matches the original toy shape).
    N, C = 8, 32
    logits = jax.random.normal(k1, (N, C), dtype=jnp.float32) * 2.0
    targets = jax.random.randint(k2, (N,), 0, C, dtype=jnp.int32)
    loss = jax.block_until_ready(focal_loss(logits, targets, alpha=1.0, gamma=2.0))
    ref = _focal_loss_ref(logits, targets, alpha=1.0, gamma=2.0)
    assert jnp.allclose(loss, ref, rtol=1e-5, atol=1e-6), (loss, ref)

    # Case 2: ragged multi-tile grid (N % tile != 0) -> in-kernel tail masking,
    # no jnp.pad of the logits.
    N2, C2 = 150, 32
    logits2 = jax.random.normal(k3, (N2, C2), dtype=jnp.float32) * 2.0
    targets2 = jax.random.randint(k4, (N2,), 0, C2, dtype=jnp.int32)
    loss2 = jax.block_until_ready(
        focal_loss(logits2, targets2, alpha=1.0, gamma=2.0, tile_rows=64)
    )
    ref2 = _focal_loss_ref(logits2, targets2, alpha=1.0, gamma=2.0)
    assert jnp.allclose(loss2, ref2, rtol=1e-5, atol=1e-6), (loss2, ref2)

    # Case 3: divisible multi-tile grid (8 tiles) with parallel semantics and
    # the fused per-tile partial-sum output.
    N3, C3 = 2048, 32
    logits3 = jax.random.normal(k5, (N3, C3), dtype=jnp.float32) * 2.0
    targets3 = jax.random.randint(k6, (N3,), 0, C3, dtype=jnp.int32)
    loss3 = jax.block_until_ready(
        focal_loss(logits3, targets3, alpha=1.0, gamma=2.0, tile_rows=256)
    )
    ref3 = _focal_loss_ref(logits3, targets3, alpha=1.0, gamma=2.0)
    assert jnp.allclose(loss3, ref3, rtol=1e-4, atol=1e-6), (loss3, ref3)

    # Case 4: bf16 logits at the boundary (halves HBM read traffic).
    loss_bf16 = jax.block_until_ready(
        focal_loss(logits2.astype(jnp.bfloat16), targets2, alpha=1.0, gamma=2.0)
    )
    ref_bf16 = _focal_loss_ref(
        logits2.astype(jnp.bfloat16).astype(jnp.float32), targets2, 1.0, 2.0
    )
    assert jnp.allclose(loss_bf16, ref_bf16, rtol=2e-2, atol=2e-3), (loss_bf16, ref_bf16)

    print("KERNEL_OK")
</pallas_src>

<mosaic_0001>
module attributes {stable_mosaic.version = 11 : i64} {
  func.func @_focal_loss_kernel(%arg0: i32, %arg1: memref<8x32xf32, #tpu.memory_space<vmem>>, %arg2: memref<8x1xi32, #tpu.memory_space<vmem>>, %arg3: memref<1x128xf32, #tpu.memory_space<vmem>>) attributes {dimension_semantics = [#tpu.dimension_semantics<parallel>], iteration_bounds = array<i64: 1>, scalar_prefetch = 0 : i64, scratch_operands = 0 : i64, tpu.core_type = #tpu.core_type<tc>, window_params = [{transform_indices = @transform_0, window_bounds = array<i64: 8, 32>}, {transform_indices = @transform_1, window_bounds = array<i64: 8, 1>}, {transform_indices = @transform_2, window_bounds = array<i64: 1, 128>}]} {
    %c0 = arith.constant 0 : index
    %c0_0 = arith.constant 0 : index
    %0 = vector.load %arg1[%c0, %c0_0] : memref<8x32xf32, #tpu.memory_space<vmem>>, vector<8x32xf32>
    %c0_1 = arith.constant 0 : index
    %c0_2 = arith.constant 0 : index
    %1 = vector.load %arg2[%c0_1, %c0_2] : memref<8x1xi32, #tpu.memory_space<vmem>>, vector<8x1xi32>
    %cst = arith.constant dense<0xFF800000> : vector<8xf32>
    %2 = vector.multi_reduction <maximumf>, %0, %cst [1] : vector<8x32xf32> to vector<8xf32>
    %3 = vector.shape_cast %2 : vector<8xf32> to vector<8x1xf32>
    %4 = vector.broadcast %3 : vector<8x1xf32> to vector<8x32xf32>
    %5 = arith.subf %0, %4 : vector<8x32xf32>
    %6 = math.exp %5 : vector<8x32xf32>
    %cst_3 = arith.constant dense<0.000000e+00> : vector<8xf32>
    %7 = vector.multi_reduction <add>, %6, %cst_3 [1] : vector<8x32xf32> to vector<8xf32>
    %8 = vector.shape_cast %7 : vector<8xf32> to vector<8x1xf32>
    %9 = math.log %8 : vector<8x1xf32>
    %10 = tpu.iota {dimensions = array<i32: 1>} : vector<8x32xi32>
    %11 = vector.broadcast %1 : vector<8x1xi32> to vector<8x32xi32>
    %12 = arith.cmpi eq, %10, %11 : vector<8x32xi32>
    %cst_4 = arith.constant 0.000000e+00 : f32
    %13 = vector.broadcast %cst_4 : f32 to vector<8x32xf32>
    %14 = arith.select %12, %5, %13 : vector<8x32xi1>, vector<8x32xf32>
    %cst_5 = arith.constant dense<0.000000e+00> : vector<8xf32>
    %15 = vector.multi_reduction <add>, %14, %cst_5 [1] : vector<8x32xf32> to vector<8xf32>
    %16 = vector.shape_cast %15 : vector<8xf32> to vector<8x1xf32>
    %17 = arith.subf %9, %16 : vector<8x1xf32>
    %cst_6 = arith.constant 0.000000e+00 : f32
    %18 = vector.broadcast %cst_6 : f32 to vector<8x1xf32>
    %19 = arith.subf %18, %17 : vector<8x1xf32>
    %20 = math.exp %19 : vector<8x1xf32>
    %cst_7 = arith.constant 1.000000e+00 : f32
    %21 = vector.broadcast %cst_7 : f32 to vector<8x1xf32>
    %22 = arith.subf %21, %20 : vector<8x1xf32>
    %23 = arith.mulf %22, %22 : vector<8x1xf32>
    %24 = arith.mulf %23, %17 : vector<8x1xf32>
    %cst_8 = arith.constant dense<0.000000e+00> : vector<1xf32>
    %25 = vector.multi_reduction <add>, %24, %cst_8 [0] : vector<8x1xf32> to vector<1xf32>
    %26 = vector.shape_cast %25 : vector<1xf32> to vector<1x1xf32>
    %27 = vector.shape_cast %26 : vector<1x1xf32> to vector<1x1xf32>
    %28 = vector.broadcast %27 : vector<1x1xf32> to vector<1x128xf32>
    %c0_9 = arith.constant 0 : index
    %c0_10 = arith.constant 0 : index
    %29 = vector.load %arg3[%c0_9, %c0_10] : memref<1x128xf32, #tpu.memory_space<vmem>>, vector<1x128xf32>
    tpu.vector_store %arg3[%c0_9, %c0_10], %28 {strides = array<i32>} : memref<1x128xf32, #tpu.memory_space<vmem>>, vector<1x128xf32>,
    return
  }
  func.func @transform_0(%arg0: i32) -> (i32, i32) {
    %c0_i32 = arith.constant 0 : i32
    %c0_i32_0 = arith.constant 0 : i32
    return %arg0, %c0_i32 : i32, i32
  }
  func.func @transform_1(%arg0: i32) -> (i32, i32) {
    %c0_i32 = arith.constant 0 : i32
    %c0_i32_0 = arith.constant 0 : i32
    return %arg0, %c0_i32 : i32, i32
  }
  func.func @transform_2(%arg0: i32) -> (i32, i32) {
    %c0_i32 = arith.constant 0 : i32
    %c0_i32_0 = arith.constant 0 : i32
    return %c0_i32, %arg0 : i32, i32
  }
}

</mosaic_0001>

<bundles_post_ra>
// kernel: tpu_custom_call.1
= control target key start
LH: loop header
LB: loop body
LE: loop exit
PB: predicated region body
PF: predicated region fallthrough
CT: control target
= control target key end

     0   :  { %vm14_vm0 = vcmask 261120   ;;  %s130_s0 = inlined_call_operand.vmem [shape: f32[8,32], index: 0, kind: input, shape index: {}]   ;;  %s131_s1 = inlined_call_operand.vmem [shape: s32[8,1], index: 1, kind: input, shape index: {}]   ;;  %s132_s2 = inlined_call_operand.hbm [shape: f32[1,128], index: 2, kind: output, shape index: {}]  }
   0x1   :  { %v12_v0 = vld [vmem:[%s130_s0] sm:$0xff] }
   0x2   :  { %7 = vsyncpa [#allocation3], 0  ;;  %v15_v1 = vsel %vm14_vm0, %v12_v0, -inf  ;;  %v101_v2 = vmov 0   ;;  %v13_v3 = vld [vmem:[%s131_s1] sm:$0xff]  ;;  %v26_v9 = vlaneseq  ;;  %s102_s0 = smov [#allocation2]  }
   0x3   :  { %68 = vset.pattern.permute.xlu0 %v101_v2  ;;  %s55_s1 = sshll.u32 %s102_s0, 4  ;;  %s57_s15 = sshll.u32 %s132_s2, 4  ;;  %s56_s1 = int_to_ptr.vmem [resolvable:$true] %s55_s1  ;;  %s58_s15 = int_to_ptr.hbm [resolvable:$true] %s57_s15 }
   0x4   :  { %16 = vmax.xlane.f32.xlu0 %v15_v1  ;;  %v27_v10 = vand.u32 127, %v26_v9 }
  0x18   :  { %29 = vperm.xlu0 %68, %v13_v3  }
  0x77   :  { %v17_v4 = vpop.xlane.xlu0 %16 }
  0x78   :  { %v18_v5 = vsub.f32 %v12_v0, %v17_v4 }
  0x7a   :  { %v19_v6 = vmul.f32 1.442695, %v18_v5 }
  0x7c   :  { %69 = vpow2.f32 %v19_v6 }
  0x82   :  { %v70_v7 = vpop.eup %69 }
  0x83   :  { %v21_v8 = vsel %vm14_vm0, %v70_v7, 0.0 }
  0x84   :  { %22 = vadd.xlane.f32.xlu1 %v21_v8 }
  0x8a   :  { %v30_v11 = vpop.permute.xlu0 %29 }
  0x8b   :  { %vm31_vm1 = vcmp.eq.s32.totalorder %v27_v10, %v30_v11 }
  0x8c   :  { %v32_v12 = vsel %vm31_vm1, %v18_v5, 0.0 }
  0x8d   :  { %v33_v13 = vsel %vm14_vm0, %v32_v12, 0.0 }
  0x8e   :  { %34 = vadd.xlane.f32.xlu1 %v33_v13 }
  0xf7   :  { %v23_v14 = vpop.xlane.xlu1 %22 }
  0xf8   :  { %71 = vlog2.f32 %v23_v14 }
  0xfe   :  { %v72_v15 = vpop.eup %71 }
  0xff   :  { %v25_v16 = vmul.f32 0.6931472, %v72_v15 }
 0x101   :  { %v35_v17 = vpop.xlane.xlu1 %34 }
 0x102   :  { %v36_v18 = vsub.f32 %v25_v16, %v35_v17 }
 0x104   :  { %v37_v19 = vsub.f32 0.0, %v36_v18 }
 0x106   :  { %v38_v20 = vmul.f32 1.442695, %v37_v19 }
 0x108   :  { %73 = vpow2.f32 %v38_v20 }
 0x10e   :  { %v74_v21 = vpop.eup %73 }
 0x10f   :  { %v40_v22 = vsub.f32 1.0, %v74_v21 }
 0x111   :  { %v41_v23 = vmul.f32 %v40_v22, %v40_v22 }
 0x113   :  { %v42_v24 = vmul.f32 %v41_v23, %v36_v18 }
 0x115   :  { %v43_v25 = vrot.slane %v42_v24, 4 }
 0x117   :  { %v44_v26 = vadd.f32 %v43_v25, %v42_v24 }
 0x119   :  { %v45_v27 = vrot.slane %v44_v26, 2 }
 0x11b   :  { %v46_v28 = vadd.f32 %v45_v27, %v44_v26 }
 0x11d   :  { %v47_v29 = vrot.slane %v46_v28, 1 }
 0x11f   :  { %v48_v30 = vadd.f32 %v47_v29, %v46_v28 }
 0x121   :  { %49 = vst [vmem:[#allocation2] sm:$0x1] %v48_v30 }
 0x122   :  { %60 = dma.vmem_to_hbm [thread:$0]  %s56_s1, 16, %s58_s15, [#allocation3]  }
 0x123   :  { %99 = dma.done.wait [#allocation3], 16  }
 0x124   :  { %100 = vsyncadd [#allocation3], 4294967280 }
 0x125   :  { %65 = vsyncpa [#allocation3], 1 }

</bundles_post_ra>
